<compile_context>
chip_gen: v5e
topology: v5e:2x2
jax: 0.10.0
libtpu: 0.0.40
codegen_flags: <defaults>
</compile_context>

<pallas_src>
from functools import partial

import jax
import jax.numpy as jnp
from jax.experimental import pallas as pl
from jax.experimental.pallas import tpu as pltpu


# ---------------------------------------------------------------------------
# Pallas kernel
# ---------------------------------------------------------------------------
def _fuse_kernel(xs_ref, xf_ref, w_ref, b_ref, out_ref, acc_ref, *,
                 k, alpha, pad, T_f):
    """One (batch, HW-tile) block per grid step.

    xs_ref : (1, C_s,       T_out, HWt)   slow pathway (pass-through)
    xf_ref : (1, C_f,       T_f,   HWt)   fast pathway (conv input)
    w_ref  : (C_out, k*C_f)               BN-scale-folded weights (tap-major cols)
    b_ref  : (C_out, 1, 1)                folded BN bias (f32)
    out_ref: (1, C_s+C_out, T_out, HWt)
    acc_ref: (C_out, T_out, HWt) f32      VMEM scratch for the fused slab
    """
    C_s = xs_ref.shape[1]
    C_f = xf_ref.shape[1]
    T_out = acc_ref.shape[1]
    HWt = xf_ref.shape[-1]

    # Slow pathway pass-through: single dense (sublane + lane aligned) copy.
    out_ref[0, :C_s, :, :] = xs_ref[0]

    w = w_ref[...]                                    # small, resident across steps
    zero_tap = jnp.zeros((C_f, HWt), xf_ref.dtype)    # trace-time zero padding

    # Temporal [k,1,1] conv, stride alpha: for each output frame gather the k
    # taps into one (k*C_f, HWt) operand and do a single fused-K MXU matmul.
    for t in range(T_out):                            # static unroll (T_out small)
        t0 = t * alpha - pad
        taps = []
        for kt in range(k):
            ti = t0 + kt
            taps.append(xf_ref[0, :, ti, :] if 0 <= ti < T_f else zero_tap)
        g = jnp.concatenate(taps, axis=0)             # (k*C_f, HWt)
        acc_ref[:, t, :] = jnp.dot(w, g, preferred_element_type=jnp.float32)

    # Hoisted bias broadcast + ReLU epilogue (f32), then ONE dense store of the
    # whole fused slab.
    y = jnp.maximum(acc_ref[...] + b_ref[...], 0.0)
    out_ref[0, C_s:, :, :] = y.astype(out_ref.dtype)


# ---------------------------------------------------------------------------
# Wrapper: BN folding + layout plumbing (reshapes only, no big-tensor transposes)
# ---------------------------------------------------------------------------
def fuse_fast_to_slow(x_s, x_f, conv_w, gamma, beta, run_mean, run_var, *,
                      fusion_kernel, alpha, eps=1e-5, hw_tile=None):
    """x_s: (N, C_s, T_s, H, W), x_f: (N, C_f, T_f, H, W),
    conv_w: (C_out, C_f, k, 1, 1).  Returns [concat(x_s, relu(bn(conv(x_f)))), x_f]."""
    N, C_s, T_s, H, W = x_s.shape
    Nf, C_f, T_f, Hf, Wf = x_f.shape
    assert (N, H, W) == (Nf, Hf, Wf)
    C_out = conv_w.shape[0]
    k = fusion_kernel
    pad = k // 2
    HW = H * W
    T_out = (T_f + 2 * pad - k) // alpha + 1
    assert T_out == T_s, "Slow/Fast temporal shapes must match after stride=alpha"

    # Fold BatchNorm (inference mode) into the conv weights and a per-channel bias.
    scale = gamma / jnp.sqrt(run_var + eps)                       # (C_out,)
    w_kcf = conv_w.reshape(C_out, C_f, k).astype(jnp.float32).transpose(0, 2, 1)
    w_flat = (w_kcf * scale[:, None, None]).reshape(C_out, k * C_f)
    w_flat = w_flat.astype(x_f.dtype)                             # bf16-friendly MXU operand
    bias = (beta - run_mean * scale).reshape(C_out, 1, 1).astype(jnp.float32)

    # Free reshapes: keep T as its own dim, lanes = H*W.
    xs_r = x_s.reshape(N, C_s, T_s, HW)
    xf_r = x_f.reshape(N, C_f, T_f, HW)

    # Spatial tiling: whole HW for small frames (large lane-dense DMAs on
    # v5e/v6e), 512-lane tiles for large frames (fits v7x's 64 MiB VMEM and
    # feeds both of its TensorCores / the DMA pipeline when N is small).
    if hw_tile is None:
        hw_tile = HW if HW <= 1024 else 512
    n_hw = pl.cdiv(HW, hw_tile)

    out = pl.pallas_call(
        partial(_fuse_kernel, k=k, alpha=alpha, pad=pad, T_f=T_f),
        out_shape=jax.ShapeDtypeStruct((N, C_s + C_out, T_out, HW), x_s.dtype),
        grid=(N, n_hw),
        in_specs=[
            pl.BlockSpec((1, C_s, T_s, hw_tile), lambda n, j: (n, 0, 0, j)),
            pl.BlockSpec((1, C_f, T_f, hw_tile), lambda n, j: (n, 0, 0, j)),
            pl.BlockSpec((C_out, k * C_f), lambda n, j: (0, 0)),      # resident
            pl.BlockSpec((C_out, 1, 1), lambda n, j: (0, 0, 0)),      # resident
        ],
        out_specs=pl.BlockSpec((1, C_s + C_out, T_out, hw_tile),
                               lambda n, j: (n, 0, 0, j)),
        scratch_shapes=[pltpu.VMEM((C_out, T_out, hw_tile), jnp.float32)],
        compiler_params=pltpu.CompilerParams(
            dimension_semantics=("parallel", "parallel"),
            vmem_limit_bytes=48 * 1024 * 1024),
    )(xs_r, xf_r, w_flat, bias)

    # Free reshape back to NCTHW (same memory order).
    return [out.reshape(N, C_s + C_out, T_out, H, W), x_f]


# ---------------------------------------------------------------------------
# Pure-JAX reference for the correctness check
# ---------------------------------------------------------------------------
def _reference(x_s, x_f, conv_w, gamma, beta, run_mean, run_var, *,
               fusion_kernel, alpha, eps=1e-5):
    N, C_f, T_f, H, W = x_f.shape
    C_out = conv_w.shape[0]
    k = fusion_kernel
    pad = k // 2
    xp = jnp.pad(x_f, ((0, 0), (0, 0), (pad, pad), (0, 0), (0, 0)))
    T_out = (T_f + 2 * pad - k) // alpha + 1
    idx = jnp.arange(T_out) * alpha
    cols = jnp.stack([xp[:, :, idx + kt] for kt in range(k)], axis=2)  # (N,C_f,k,T_out,H,W)
    w = conv_w.reshape(C_out, C_f, k)
    fuse = jnp.einsum('ock,ncktxy->notxy', w, cols)
    scale = gamma / jnp.sqrt(run_var + eps)
    bias = beta - run_mean * scale
    fuse = fuse * scale[None, :, None, None, None] + bias[None, :, None, None, None]
    fuse = jnp.maximum(fuse, 0.0)
    return jnp.concatenate([x_s, fuse], axis=1)


if __name__ == "__main__":
    # Small SlowFast-style shapes.
    N, H, W = 2, 8, 8
    dim_in = 4                       # fast-pathway channels (C_f)
    fusion_conv_channel_ratio = 2    # -> C_out = 8
    fusion_kernel = 5
    alpha = 4
    C_s = 8                          # slow-pathway channels
    T_f = 16
    T_s = T_f // alpha

    key = jax.random.PRNGKey(0)
    k1, k2, k3, k4, k5, k6, k7 = jax.random.split(key, 7)

    x_s = jax.random.normal(k1, (N, C_s, T_s, H, W), dtype=jnp.float32)
    x_f = jax.random.normal(k2, (N, dim_in, T_f, H, W), dtype=jnp.float32)

    C_out = dim_in * fusion_conv_channel_ratio
    conv_w = 0.1 * jax.random.normal(k3, (C_out, dim_in, fusion_kernel, 1, 1),
                                     dtype=jnp.float32)
    gamma = 1.0 + 0.1 * jax.random.normal(k4, (C_out,), dtype=jnp.float32)
    beta = 0.1 * jax.random.normal(k5, (C_out,), dtype=jnp.float32)
    run_mean = 0.05 * jax.random.normal(k6, (C_out,), dtype=jnp.float32)
    run_var = jnp.abs(1.0 + 0.1 * jax.random.normal(k7, (C_out,), dtype=jnp.float32))

    # TODO(synk): BatchNorm is implemented in inference mode (running stats folded);
    # training-mode batch statistics / running-stat updates are not computed in-kernel.

    fuse_fn = jax.jit(partial(fuse_fast_to_slow,
                              fusion_kernel=fusion_kernel, alpha=alpha))

    # float32 path: exact parity with the reference.
    x_s_fuse, x_f_out = fuse_fn(x_s, x_f, conv_w, gamma, beta, run_mean, run_var)
    jax.block_until_ready(x_s_fuse)
    jax.block_until_ready(x_f_out)

    ref = _reference(x_s, x_f, conv_w, gamma, beta, run_mean, run_var,
                     fusion_kernel=fusion_kernel, alpha=alpha)
    assert x_s_fuse.shape == (N, C_s + C_out, T_s, H, W)
    assert jnp.allclose(x_s_fuse, ref, atol=1e-4, rtol=1e-4)
    assert jnp.array_equal(x_f_out, x_f)

    # bfloat16 activation path (halves HBM traffic; f32 MXU accumulation + f32 epilogue).
    x_s_fuse_bf16, _ = fuse_fn(x_s.astype(jnp.bfloat16), x_f.astype(jnp.bfloat16),
                               conv_w, gamma, beta, run_mean, run_var)
    jax.block_until_ready(x_s_fuse_bf16)
    assert x_s_fuse_bf16.dtype == jnp.bfloat16
    assert jnp.allclose(x_s_fuse_bf16.astype(jnp.float32), ref, atol=1e-1, rtol=1e-1)

    print("KERNEL_OK")
</pallas_src>

<mosaic_0001>
module attributes {stable_mosaic.version = 11 : i64} {
  func.func @_fuse_kernel(%arg0: i32, %arg1: i32, %arg2: memref<1x8x4x64xf32, #tpu.memory_space<vmem>>, %arg3: memref<1x4x16x64xf32, #tpu.memory_space<vmem>>, %arg4: memref<8x20xf32, #tpu.memory_space<vmem>>, %arg5: memref<8x1x1xf32, #tpu.memory_space<vmem>>, %arg6: memref<1x16x4x64xf32, #tpu.memory_space<vmem>>, %arg7: memref<8x4x64xf32, #tpu.memory_space<vmem>>) attributes {dimension_semantics = [#tpu.dimension_semantics<parallel>, #tpu.dimension_semantics<parallel>], iteration_bounds = array<i64: 2, 1>, scalar_prefetch = 0 : i64, scratch_operands = 1 : i64, tpu.core_type = #tpu.core_type<tc>, window_params = [{transform_indices = @transform_0, window_bounds = array<i64: 1, 8, 4, 64>}, {transform_indices = @transform_1, window_bounds = array<i64: 1, 4, 16, 64>}, {pipeline_mode = #tpu.pipeline_mode<synchronous>, transform_indices = @transform_2, window_bounds = array<i64: 8, 20>}, {pipeline_mode = #tpu.pipeline_mode<synchronous>, transform_indices = @transform_3, window_bounds = array<i64: 8, 1, 1>}, {transform_indices = @transform_4, window_bounds = array<i64: 1, 16, 4, 64>}]} {
    %c0 = arith.constant 0 : index
    %c0_0 = arith.constant 0 : index
    %c0_1 = arith.constant 0 : index
    %c0_2 = arith.constant 0 : index
    %0 = vector.load %arg2[%c0, %c0_0, %c0_1, %c0_2] : memref<1x8x4x64xf32, #tpu.memory_space<vmem>>, vector<1x8x4x64xf32>
    %1 = vector.shape_cast %0 : vector<1x8x4x64xf32> to vector<8x4x64xf32>
    %c0_3 = arith.constant 0 : index
    %c0_4 = arith.constant 0 : index
    %c0_5 = arith.constant 0 : index
    %c0_6 = arith.constant 0 : index
    %2 = vector.load %arg6[%c0_3, %c0_4, %c0_5, %c0_6] : memref<1x16x4x64xf32, #tpu.memory_space<vmem>>, vector<1x8x4x64xf32>
    %3 = vector.shape_cast %2 : vector<1x8x4x64xf32> to vector<8x4x64xf32>
    %4 = vector.shape_cast %1 : vector<8x4x64xf32> to vector<1x8x4x64xf32>
    tpu.vector_store %arg6[%c0_3, %c0_4, %c0_5, %c0_6], %4 {strides = array<i32>} : memref<1x16x4x64xf32, #tpu.memory_space<vmem>>, vector<1x8x4x64xf32>,
    %c0_7 = arith.constant 0 : index
    %c0_8 = arith.constant 0 : index
    %5 = vector.load %arg4[%c0_7, %c0_8] : memref<8x20xf32, #tpu.memory_space<vmem>>, vector<8x20xf32>
    %cst = arith.constant 0.000000e+00 : f32
    %6 = vector.broadcast %cst : f32 to vector<4x64xf32>
    %c0_9 = arith.constant 0 : index
    %c0_10 = arith.constant 0 : index
    %c0_11 = arith.constant 0 : index
    %c0_12 = arith.constant 0 : index
    %7 = vector.load %arg3[%c0_9, %c0_10, %c0_11, %c0_12] : memref<1x4x16x64xf32, #tpu.memory_space<vmem>>, vector<1x4x1x64xf32>
    %8 = vector.shape_cast %7 : vector<1x4x1x64xf32> to vector<4x64xf32>
    %c0_13 = arith.constant 0 : index
    %c0_14 = arith.constant 0 : index
    %c1 = arith.constant 1 : index
    %c0_15 = arith.constant 0 : index
    %9 = vector.load %arg3[%c0_13, %c0_14, %c1, %c0_15] : memref<1x4x16x64xf32, #tpu.memory_space<vmem>>, vector<1x4x1x64xf32>
    %10 = vector.shape_cast %9 : vector<1x4x1x64xf32> to vector<4x64xf32>
    %c0_16 = arith.constant 0 : index
    %c0_17 = arith.constant 0 : index
    %c2 = arith.constant 2 : index
    %c0_18 = arith.constant 0 : index
    %11 = vector.load %arg3[%c0_16, %c0_17, %c2, %c0_18] : memref<1x4x16x64xf32, #tpu.memory_space<vmem>>, vector<1x4x1x64xf32>
    %12 = vector.shape_cast %11 : vector<1x4x1x64xf32> to vector<4x64xf32>
    %13 = tpu.concatenate %6, %6, %8, %10, %12 in 0 : vector<4x64xf32>, vector<4x64xf32>, vector<4x64xf32>, vector<4x64xf32>, vector<4x64xf32> -> vector<20x64xf32>
    %cst_19 = arith.constant dense<0.000000e+00> : vector<8x64xf32>
    %14 = tpu.matmul %5, %13, %cst_19 {dimension_numbers = #tpu.dot_dimension_numbers<[1], [0], [0], [1], [0, 0, 1, 1], [], []>} : vector<8x20xf32>, vector<20x64xf32>, vector<8x64xf32> -> vector<8x64xf32>
    %c0_20 = arith.constant 0 : index
    %c0_21 = arith.constant 0 : index
    %c0_22 = arith.constant 0 : index
    %15 = vector.load %arg7[%c0_20, %c0_21, %c0_22] : memref<8x4x64xf32, #tpu.memory_space<vmem>>, vector<8x1x64xf32>
    %16 = vector.shape_cast %15 : vector<8x1x64xf32> to vector<8x64xf32>
    %17 = vector.shape_cast %14 : vector<8x64xf32> to vector<8x1x64xf32>
    tpu.vector_store %arg7[%c0_20, %c0_21, %c0_22], %17 {strides = array<i32>} : memref<8x4x64xf32, #tpu.memory_space<vmem>>, vector<8x1x64xf32>,
    %c0_23 = arith.constant 0 : index
    %c0_24 = arith.constant 0 : index
    %c2_25 = arith.constant 2 : index
    %c0_26 = arith.constant 0 : index
    %18 = vector.load %arg3[%c0_23, %c0_24, %c2_25, %c0_26] : memref<1x4x16x64xf32, #tpu.memory_space<vmem>>, vector<1x4x1x64xf32>
    %19 = vector.shape_cast %18 : vector<1x4x1x64xf32> to vector<4x64xf32>
    %c0_27 = arith.constant 0 : index
    %c0_28 = arith.constant 0 : index
    %c3 = arith.constant 3 : index
    %c0_29 = arith.constant 0 : index
    %20 = vector.load %arg3[%c0_27, %c0_28, %c3, %c0_29] : memref<1x4x16x64xf32, #tpu.memory_space<vmem>>, vector<1x4x1x64xf32>
    %21 = vector.shape_cast %20 : vector<1x4x1x64xf32> to vector<4x64xf32>
    %c0_30 = arith.constant 0 : index
    %c0_31 = arith.constant 0 : index
    %c4 = arith.constant 4 : index
    %c0_32 = arith.constant 0 : index
    %22 = vector.load %arg3[%c0_30, %c0_31, %c4, %c0_32] : memref<1x4x16x64xf32, #tpu.memory_space<vmem>>, vector<1x4x1x64xf32>
    %23 = vector.shape_cast %22 : vector<1x4x1x64xf32> to vector<4x64xf32>
    %c0_33 = arith.constant 0 : index
    %c0_34 = arith.constant 0 : index
    %c5 = arith.constant 5 : index
    %c0_35 = arith.constant 0 : index
    %24 = vector.load %arg3[%c0_33, %c0_34, %c5, %c0_35] : memref<1x4x16x64xf32, #tpu.memory_space<vmem>>, vector<1x4x1x64xf32>
    %25 = vector.shape_cast %24 : vector<1x4x1x64xf32> to vector<4x64xf32>
    %c0_36 = arith.constant 0 : index
    %c0_37 = arith.constant 0 : index
    %c6 = arith.constant 6 : index
    %c0_38 = arith.constant 0 : index
    %26 = vector.load %arg3[%c0_36, %c0_37, %c6, %c0_38] : memref<1x4x16x64xf32, #tpu.memory_space<vmem>>, vector<1x4x1x64xf32>
    %27 = vector.shape_cast %26 : vector<1x4x1x64xf32> to vector<4x64xf32>
    %28 = tpu.concatenate %19, %21, %23, %25, %27 in 0 : vector<4x64xf32>, vector<4x64xf32>, vector<4x64xf32>, vector<4x64xf32>, vector<4x64xf32> -> vector<20x64xf32>
    %cst_39 = arith.constant dense<0.000000e+00> : vector<8x64xf32>
    %29 = tpu.matmul %5, %28, %cst_39 {dimension_numbers = #tpu.dot_dimension_numbers<[1], [0], [0], [1], [0, 0, 1, 1], [], []>} : vector<8x20xf32>, vector<20x64xf32>, vector<8x64xf32> -> vector<8x64xf32>
    %c0_40 = arith.constant 0 : index
    %c1_41 = arith.constant 1 : index
    %c0_42 = arith.constant 0 : index
    %30 = vector.load %arg7[%c0_40, %c1_41, %c0_42] : memref<8x4x64xf32, #tpu.memory_space<vmem>>, vector<8x1x64xf32>
    %31 = vector.shape_cast %30 : vector<8x1x64xf32> to vector<8x64xf32>
    %32 = vector.shape_cast %29 : vector<8x64xf32> to vector<8x1x64xf32>
    tpu.vector_store %arg7[%c0_40, %c1_41, %c0_42], %32 {strides = array<i32>} : memref<8x4x64xf32, #tpu.memory_space<vmem>>, vector<8x1x64xf32>,
    %c0_43 = arith.constant 0 : index
    %c0_44 = arith.constant 0 : index
    %c6_45 = arith.constant 6 : index
    %c0_46 = arith.constant 0 : index
    %33 = vector.load %arg3[%c0_43, %c0_44, %c6_45, %c0_46] : memref<1x4x16x64xf32, #tpu.memory_space<vmem>>, vector<1x4x1x64xf32>
    %34 = vector.shape_cast %33 : vector<1x4x1x64xf32> to vector<4x64xf32>
    %c0_47 = arith.constant 0 : index
    %c0_48 = arith.constant 0 : index
    %c7 = arith.constant 7 : index
    %c0_49 = arith.constant 0 : index
    %35 = vector.load %arg3[%c0_47, %c0_48, %c7, %c0_49] : memref<1x4x16x64xf32, #tpu.memory_space<vmem>>, vector<1x4x1x64xf32>
    %36 = vector.shape_cast %35 : vector<1x4x1x64xf32> to vector<4x64xf32>
    %c0_50 = arith.constant 0 : index
    %c0_51 = arith.constant 0 : index
    %c8 = arith.constant 8 : index
    %c0_52 = arith.constant 0 : index
    %37 = vector.load %arg3[%c0_50, %c0_51, %c8, %c0_52] : memref<1x4x16x64xf32, #tpu.memory_space<vmem>>, vector<1x4x1x64xf32>
    %38 = vector.shape_cast %37 : vector<1x4x1x64xf32> to vector<4x64xf32>
    %c0_53 = arith.constant 0 : index
    %c0_54 = arith.constant 0 : index
    %c9 = arith.constant 9 : index
    %c0_55 = arith.constant 0 : index
    %39 = vector.load %arg3[%c0_53, %c0_54, %c9, %c0_55] : memref<1x4x16x64xf32, #tpu.memory_space<vmem>>, vector<1x4x1x64xf32>
    %40 = vector.shape_cast %39 : vector<1x4x1x64xf32> to vector<4x64xf32>
    %c0_56 = arith.constant 0 : index
    %c0_57 = arith.constant 0 : index
    %c10 = arith.constant 10 : index
    %c0_58 = arith.constant 0 : index
    %41 = vector.load %arg3[%c0_56, %c0_57, %c10, %c0_58] : memref<1x4x16x64xf32, #tpu.memory_space<vmem>>, vector<1x4x1x64xf32>
    %42 = vector.shape_cast %41 : vector<1x4x1x64xf32> to vector<4x64xf32>
    %43 = tpu.concatenate %34, %36, %38, %40, %42 in 0 : vector<4x64xf32>, vector<4x64xf32>, vector<4x64xf32>, vector<4x64xf32>, vector<4x64xf32> -> vector<20x64xf32>
    %cst_59 = arith.constant dense<0.000000e+00> : vector<8x64xf32>
    %44 = tpu.matmul %5, %43, %cst_59 {dimension_numbers = #tpu.dot_dimension_numbers<[1], [0], [0], [1], [0, 0, 1, 1], [], []>} : vector<8x20xf32>, vector<20x64xf32>, vector<8x64xf32> -> vector<8x64xf32>
    %c0_60 = arith.constant 0 : index
    %c2_61 = arith.constant 2 : index
    %c0_62 = arith.constant 0 : index
    %45 = vector.load %arg7[%c0_60, %c2_61, %c0_62] : memref<8x4x64xf32, #tpu.memory_space<vmem>>, vector<8x1x64xf32>
    %46 = vector.shape_cast %45 : vector<8x1x64xf32> to vector<8x64xf32>
    %47 = vector.shape_cast %44 : vector<8x64xf32> to vector<8x1x64xf32>
    tpu.vector_store %arg7[%c0_60, %c2_61, %c0_62], %47 {strides = array<i32>} : memref<8x4x64xf32, #tpu.memory_space<vmem>>, vector<8x1x64xf32>,
    %c0_63 = arith.constant 0 : index
    %c0_64 = arith.constant 0 : index
    %c10_65 = arith.constant 10 : index
    %c0_66 = arith.constant 0 : index
    %48 = vector.load %arg3[%c0_63, %c0_64, %c10_65, %c0_66] : memref<1x4x16x64xf32, #tpu.memory_space<vmem>>, vector<1x4x1x64xf32>
    %49 = vector.shape_cast %48 : vector<1x4x1x64xf32> to vector<4x64xf32>
    %c0_67 = arith.constant 0 : index
    %c0_68 = arith.constant 0 : index
    %c11 = arith.constant 11 : index
    %c0_69 = arith.constant 0 : index
    %50 = vector.load %arg3[%c0_67, %c0_68, %c11, %c0_69] : memref<1x4x16x64xf32, #tpu.memory_space<vmem>>, vector<1x4x1x64xf32>
    %51 = vector.shape_cast %50 : vector<1x4x1x64xf32> to vector<4x64xf32>
    %c0_70 = arith.constant 0 : index
    %c0_71 = arith.constant 0 : index
    %c12 = arith.constant 12 : index
    %c0_72 = arith.constant 0 : index
    %52 = vector.load %arg3[%c0_70, %c0_71, %c12, %c0_72] : memref<1x4x16x64xf32, #tpu.memory_space<vmem>>, vector<1x4x1x64xf32>
    %53 = vector.shape_cast %52 : vector<1x4x1x64xf32> to vector<4x64xf32>
    %c0_73 = arith.constant 0 : index
    %c0_74 = arith.constant 0 : index
    %c13 = arith.constant 13 : index
    %c0_75 = arith.constant 0 : index
    %54 = vector.load %arg3[%c0_73, %c0_74, %c13, %c0_75] : memref<1x4x16x64xf32, #tpu.memory_space<vmem>>, vector<1x4x1x64xf32>
    %55 = vector.shape_cast %54 : vector<1x4x1x64xf32> to vector<4x64xf32>
    %c0_76 = arith.constant 0 : index
    %c0_77 = arith.constant 0 : index
    %c14 = arith.constant 14 : index
    %c0_78 = arith.constant 0 : index
    %56 = vector.load %arg3[%c0_76, %c0_77, %c14, %c0_78] : memref<1x4x16x64xf32, #tpu.memory_space<vmem>>, vector<1x4x1x64xf32>
    %57 = vector.shape_cast %56 : vector<1x4x1x64xf32> to vector<4x64xf32>
    %58 = tpu.concatenate %49, %51, %53, %55, %57 in 0 : vector<4x64xf32>, vector<4x64xf32>, vector<4x64xf32>, vector<4x64xf32>, vector<4x64xf32> -> vector<20x64xf32>
    %cst_79 = arith.constant dense<0.000000e+00> : vector<8x64xf32>
    %59 = tpu.matmul %5, %58, %cst_79 {dimension_numbers = #tpu.dot_dimension_numbers<[1], [0], [0], [1], [0, 0, 1, 1], [], []>} : vector<8x20xf32>, vector<20x64xf32>, vector<8x64xf32> -> vector<8x64xf32>
    %c0_80 = arith.constant 0 : index
    %c3_81 = arith.constant 3 : index
    %c0_82 = arith.constant 0 : index
    %60 = vector.load %arg7[%c0_80, %c3_81, %c0_82] : memref<8x4x64xf32, #tpu.memory_space<vmem>>, vector<8x1x64xf32>
    %61 = vector.shape_cast %60 : vector<8x1x64xf32> to vector<8x64xf32>
    %62 = vector.shape_cast %59 : vector<8x64xf32> to vector<8x1x64xf32>
    tpu.vector_store %arg7[%c0_80, %c3_81, %c0_82], %62 {strides = array<i32>} : memref<8x4x64xf32, #tpu.memory_space<vmem>>, vector<8x1x64xf32>,
    %c0_83 = arith.constant 0 : index
    %c0_84 = arith.constant 0 : index
    %c0_85 = arith.constant 0 : index
    %63 = vector.load %arg7[%c0_83, %c0_84, %c0_85] : memref<8x4x64xf32, #tpu.memory_space<vmem>>, vector<8x4x64xf32>
    %c0_86 = arith.constant 0 : index
    %c0_87 = arith.constant 0 : index
    %c0_88 = arith.constant 0 : index
    %64 = vector.load %arg5[%c0_86, %c0_87, %c0_88] : memref<8x1x1xf32, #tpu.memory_space<vmem>>, vector<8x1x1xf32>
    %65 = vector.broadcast %64 : vector<8x1x1xf32> to vector<8x4x64xf32>
    %66 = arith.addf %63, %65 : vector<8x4x64xf32>
    %cst_89 = arith.constant 0.000000e+00 : f32
    %67 = vector.broadcast %cst_89 : f32 to vector<8x4x64xf32>
    %68 = arith.maximumf %66, %67 : vector<8x4x64xf32>
    %c0_90 = arith.constant 0 : index
    %c8_91 = arith.constant 8 : index
    %c0_92 = arith.constant 0 : index
    %c0_93 = arith.constant 0 : index
    %69 = vector.load %arg6[%c0_90, %c8_91, %c0_92, %c0_93] : memref<1x16x4x64xf32, #tpu.memory_space<vmem>>, vector<1x8x4x64xf32>
    %70 = vector.shape_cast %69 : vector<1x8x4x64xf32> to vector<8x4x64xf32>
    %71 = vector.shape_cast %68 : vector<8x4x64xf32> to vector<1x8x4x64xf32>
    tpu.vector_store %arg6[%c0_90, %c8_91, %c0_92, %c0_93], %71 {strides = array<i32>} : memref<1x16x4x64xf32, #tpu.memory_space<vmem>>, vector<1x8x4x64xf32>,
    return
  }
  func.func @transform_0(%arg0: i32, %arg1: i32) -> (i32, i32, i32, i32) {
    %c0_i32 = arith.constant 0 : i32
    %c0_i32_0 = arith.constant 0 : i32
    %c0_i32_1 = arith.constant 0 : i32
    return %arg0, %c0_i32, %c0_i32_0, %arg1 : i32, i32, i32, i32
  }
  func.func @transform_1(%arg0: i32, %arg1: i32) -> (i32, i32, i32, i32) {
    %c0_i32 = arith.constant 0 : i32
    %c0_i32_0 = arith.constant 0 : i32
    %c0_i32_1 = arith.constant 0 : i32
    return %arg0, %c0_i32, %c0_i32_0, %arg1 : i32, i32, i32, i32
  }
  func.func @transform_2(%arg0: i32, %arg1: i32) -> (i32, i32) {
    %c0_i32 = arith.constant 0 : i32
    %c0_i32_0 = arith.constant 0 : i32
    %c0_i32_1 = arith.constant 0 : i32
    return %c0_i32, %c0_i32_0 : i32, i32
  }
  func.func @transform_3(%arg0: i32, %arg1: i32) -> (i32, i32, i32) {
    %c0_i32 = arith.constant 0 : i32
    %c0_i32_0 = arith.constant 0 : i32
    %c0_i32_1 = arith.constant 0 : i32
    %c0_i32_2 = arith.constant 0 : i32
    return %c0_i32, %c0_i32_0, %c0_i32_1 : i32, i32, i32
  }
  func.func @transform_4(%arg0: i32, %arg1: i32) -> (i32, i32, i32, i32) {
    %c0_i32 = arith.constant 0 : i32
    %c0_i32_0 = arith.constant 0 : i32
    %c0_i32_1 = arith.constant 0 : i32
    return %arg0, %c0_i32, %c0_i32_0, %arg1 : i32, i32, i32, i32
  }
}

</mosaic_0001>

<bundles_post_ra>
// kernel: fuse_fast_to_slow.1
= control target key start
LH: loop header
LB: loop body
LE: loop exit
PB: predicated region body
PF: predicated region fallthrough
CT: control target
= control target key end

     0   :  { %s1060_s15 = smov 0   ;;  %s1062_s16 = smov 0   ;;  %s1356_s0 = inlined_call_operand.vmem [shape: f32[2,8,4,64], index: 0, kind: input, shape index: {}]   ;;  %s1357_s1 = inlined_call_operand.vmem [shape: f32[2,4,16,64], index: 1, kind: input, shape index: {}]   ;;  %s1358_s2 = inlined_call_operand.vmem [shape: f32[8,20], index: 2, kind: input, shape index: {}]   ;;  %s1359_s3 = inlined_call_operand.vmem [shape: f32[8,1,1], index: 3, kind: input, shape index: {}]   ;;  %s1360_s4 = inlined_call_operand.vmem [shape: f32[2,16,4,64], index: 4, kind: output, shape index: {}]  }
   0x1   :  { %s1064_s17 = smov 0  }
   0x2 LB: > { %s26_s18 = sadd.s32 1, %s1027_s16  ;;  %p944_p0 = scmp.ge.s32.totalorder %s1031_s17, 1  ;;  %s1031_s17 = sphi %s1064_s17, %s14_s17   ;;  %s1027_s16 = sphi %s1062_s16, %s1362_s16   ;;  %s1023_s15 = sphi %s1060_s15, %s1361_s15  }
   0x3   : > { %p28_p1 = scmp.ge.s32.totalorder %s26_s18, 2  ;;  %p196_p2 = scmp.lt.s32.totalorder %s1031_s17, 3 }
   0x5   : > { %s1364_s18 = smov (%p28_p1, %s26_s18), 0  ;;  %p197_p3 = pnand %p944_p0, %p196_p2 }
   0x6   : > { %p236_p4 = scmp.lt.s32.totalorder (!%p197_p3), %s1023_s15, 1 }
   0x7   : > { %200 = sbr.rel (%p197_p3) target bundleno = 214 (0xd6), region = 36 }
   0xc   : > { %v1001_v0 = vld [vmem:[%s1359_s3 + $0x2] ss:$0 sm:$0xff]  ;;  %v1033_v1 = vmov 0   ;;  %v1002_v2 = vld [vmem:[%s1359_s3] ss:$0 sm:$0xff]  ;;  %s1366_s15 = smov (!%p236_p4, %s1023_s15), 1 }
   0xd   : > { %999 = vset.pattern.permute.xlu1 %v1033_v1  ;;  %998 = vset.pattern.permute.xlu0 %v1033_v1  ;;  %vm295_vm0 = vcmask 1041409   ;;  %vm298_vm1 = vcmask 1042434   ;;  %vm301_vm2 = vcmask 1043459   ;;  %vm329_vm3 = vcmask 1043456   ;;  %s970_s23 = sshll.u32 %s1366_s15, 6  ;;  %s969_s19 = sshll.u32 %s1366_s15, 5 }
   0xe   : > { %791 = vperm.xlu1 %999, %v1001_v0   ;;  %1000 = vset.pattern.permute.xlu2 %v1033_v1  ;;  %vm310_vm4 = vcmask 1045509   ;;  %v1003_v3 = vld [vmem:[%s1359_s3 + $0x3] ss:$0 sm:$0xff]  ;;  %s1095_s28 = scalar_lea.vmem %s1357_s1, %s970_s23  ;;  %v1004_v4 = vld [vmem:[%s1359_s3 + $0x1] ss:$0 sm:$0xff]  ;;  %vm313_vm5 = vcmask 1046534   ;;  %s1266_s22 = scalar_lea.vmem %s1356_s0, %s969_s19 }
   0xf   : > { %783 = vperm.xlu0 %998, %v1002_v2   ;;  %v520_v5 = vld [vmem:[%s1095_s28 + $0xa] sm:$0x1]  ;;  %v521_v6 = vld [vmem:[%s1095_s28 + $0x1a] sm:$0x1]  ;;  %v643_v11 = vld [vmem:[%s1095_s28 + $0xe] sm:$0x1]  ;;  %s1275_s26 = scalar_lea.vmem %s1360_s4, %s970_s23 }
  0x10   : > { %v522_v7 = vld [vmem:[%s1095_s28 + $0x2a] sm:$0x1]  ;;  %v523_v8 = vld [vmem:[%s1095_s28 + $0x3a] sm:$0x1]  ;;  %v574_v9 = vrot.slane %v521_v6, 7  ;;  %vm316_vm6 = vcmask 1047559  }
  0x11   : > { %v576_v10 = vrot.slane %v522_v7, 6  ;;  %v578_v12 = vrot.slane %v523_v8, 5  ;;  %v644_v13 = vld [vmem:[%s1095_s28 + $0x1e] sm:$0x1]  ;;  %v645_v14 = vld [vmem:[%s1095_s28 + $0x2e] sm:$0x1] }
  0x12   : > { %v575_v15 = vsel %vm295_vm0, %v574_v9, %v520_v5  ;;  %v646_v16 = vld [vmem:[%s1095_s28 + $0x3e] sm:$0x1]  ;;  %v697_v17 = vrot.slane %v644_v13, 7  ;;  %v699_v18 = vrot.slane %v645_v14, 6  ;;  %v512_v19 = vld [vmem:[%s1095_s28 + $0x8] sm:$0x1] }
  0x13   : > { %v577_v20 = vsel %vm298_vm1, %v576_v10, %v575_v15  ;;  %v701_v21 = vrot.slane %v646_v16, 5  ;;  %v513_v22 = vld [vmem:[%s1095_s28 + $0x18] sm:$0x1]  ;;  %v514_v23 = vld [vmem:[%s1095_s28 + $0x28] sm:$0x1]  ;;  %vm331_vm7 = vcmask 162816  }
  0x14   : > { %v579_v24 = vsel %vm301_vm2, %v578_v12, %v577_v20  ;;  %v698_v25 = vsel %vm295_vm0, %v697_v17, %v643_v11  ;;  %v515_v26 = vld [vmem:[%s1095_s28 + $0x38] sm:$0x1]  ;;  %v516_v27 = vld [vmem:[%s1095_s28 + $0x9] sm:$0x1]  ;;  %v517_v28 = vld [vmem:[%s1095_s28 + $0x19] sm:$0x1] }
  0x15   : > { %955 = vmatpush.msk.msra.mxu2 %vm329_vm3, %v579_v24  ;;  %v700_v29 = vsel %vm298_vm1, %v699_v18, %v698_v25  ;;  %v518_v30 = vld [vmem:[%s1095_s28 + $0x29] sm:$0x1]  ;;  %v519_v31 = vld [vmem:[%s1095_s28 + $0x39] sm:$0x1]  ;;  %v551_v32 = vrot.slane %v513_v22, 7  ;;  %v553_v33 = vrot.slane %v514_v23, 6 }
  0x16   : > { %795 = vperm.xlu1 %999, %v1003_v3   ;;  %v702_v34 = vsel %vm301_vm2, %v701_v21, %v700_v29  ;;  %v555_v35 = vrot.slane %v515_v26, 5  ;;  %v562_v36 = vrot.slane %v516_v27, 4  ;;  %v563_v37 = vrot.slane %v517_v28, 3  ;;  %v635_v38 = vld [vmem:[%s1095_s28 + $0xc] sm:$0x1] }
  0x17   : > { %787 = vperm.xlu0 %998, %v1004_v4   ;;  %957 = vmatpush.msk.msra.mxu3 %vm329_vm3, %v702_v34  ;;  %v552_v39 = vsel %vm295_vm0, %v551_v32, %v512_v19  ;;  %v565_v40 = vrot.slane %v518_v30, 2  ;;  %v567_v41 = vrot.slane %v519_v31, 1  ;;  %v636_v42 = vld [vmem:[%s1095_s28 + $0x1c] sm:$0x1]  ;;  %v637_v43 = vld [vmem:[%s1095_s28 + $0x2c] sm:$0x1] }
  0x18   : > { %v554_v44 = vsel %vm298_vm1, %v553_v33, %v552_v39  ;;  %v564_v45 = vsel %vm310_vm4, %v563_v37, %v562_v36  ;;  %v638_v46 = vld [vmem:[%s1095_s28 + $0x3c] sm:$0x1]  ;;  %v639_v47 = vld [vmem:[%s1095_s28 + $0xd] sm:$0x1]  ;;  %v640_v48 = vld [vmem:[%s1095_s28 + $0x1d] sm:$0x1] }
  0x19   : > { %v556_v49 = vsel %vm301_vm2, %v555_v35, %v554_v44  ;;  %v566_v50 = vsel %vm313_vm5, %v565_v40, %v564_v45  ;;  %v641_v51 = vld [vmem:[%s1095_s28 + $0x2d] sm:$0x1]  ;;  %v642_v52 = vld [vmem:[%s1095_s28 + $0x3d] sm:$0x1]  ;;  %v674_v53 = vrot.slane %v636_v42, 7  ;;  %v676_v54 = vrot.slane %v637_v43, 6 }
  0x1a   : > { %v568_v55 = vsel %vm316_vm6, %v567_v41, %v566_v50  ;;  %v678_v56 = vrot.slane %v638_v46, 5  ;;  %v685_v57 = vrot.slane %v639_v47, 4  ;;  %v686_v58 = vrot.slane %v640_v48, 3  ;;  %v504_v59 = vld [vmem:[%s1095_s28 + $0x6] sm:$0x1] }
  0x1b   : > { %v581_v60 = vsel %vm329_vm3, %v556_v49, %v568_v55  ;;  %v675_v61 = vsel %vm295_vm0, %v674_v53, %v635_v38  ;;  %v688_v62 = vrot.slane %v641_v51, 2  ;;  %v690_v63 = vrot.slane %v642_v52, 1  ;;  %v505_v0 = vld [vmem:[%s1095_s28 + $0x16] sm:$0x1]  ;;  %v506_v1 = vld [vmem:[%s1095_s28 + $0x26] sm:$0x1] }
  0x1c   : > { %598 = vmatpush.msra.mxu2 %v581_v60  ;;  %v677_v2 = vsel %vm298_vm1, %v676_v54, %v675_v61  ;;  %v687_v3 = vsel %vm310_vm4, %v686_v58, %v685_v57  ;;  %v507_v4 = vld [vmem:[%s1095_s28 + $0x36] sm:$0x1]  ;;  %v508_v5 = vld [vmem:[%s1095_s28 + $0x7] sm:$0x1]  ;;  %v509_v6 = vld [vmem:[%s1095_s28 + $0x17] sm:$0x1] }
  0x1d   : > { %v679_v7 = vsel %vm301_vm2, %v678_v56, %v677_v2  ;;  %v689_v8 = vsel %vm313_vm5, %v688_v62, %v687_v3  ;;  %v510_v9 = vld [vmem:[%s1095_s28 + $0x27] sm:$0x1]  ;;  %v511_v10 = vld [vmem:[%s1095_s28 + $0x37] sm:$0x1]  ;;  %v528_v11 = vrot.slane %v505_v0, 7  ;;  %v530_v12 = vrot.slane %v506_v1, 6 }
  0x1e   : > { %v691_v13 = vsel %vm316_vm6, %v690_v63, %v689_v8  ;;  %v532_v14 = vrot.slane %v507_v4, 5  ;;  %v539_v15 = vrot.slane %v508_v5, 4  ;;  %v540_v16 = vrot.slane %v509_v6, 3  ;;  %v627_v17 = vld [vmem:[%s1095_s28 + $0xa] sm:$0x1]  ;;  %v1171_v39 = vld [vmem:[%s1358_s2] sm:$0xff] }
  0x1f   : > { %v704_v18 = vsel %vm329_vm3, %v679_v7, %v691_v13  ;;  %v529_v19 = vsel %vm295_vm0, %v528_v11, %v504_v59  ;;  %v542_v20 = vrot.slane %v510_v9, 2  ;;  %v544_v21 = vrot.slane %v511_v10, 1  ;;  %v628_v22 = vld [vmem:[%s1095_s28 + $0x1a] sm:$0x1]  ;;  %v629_v23 = vld [vmem:[%s1095_s28 + $0x2a] sm:$0x1] }
  0x20   : > { %721 = vmatpush.msra.mxu3 %v704_v18  ;;  %v531_v24 = vsel %vm298_vm1, %v530_v12, %v529_v19  ;;  %v541_v25 = vsel %vm310_vm4, %v540_v16, %v539_v15  ;;  %v630_v26 = vld [vmem:[%s1095_s28 + $0x3a] sm:$0x1]  ;;  %v631_v27 = vld [vmem:[%s1095_s28 + $0xb] sm:$0x1]  ;;  %v632_v28 = vld [vmem:[%s1095_s28 + $0x1b] sm:$0x1] }
  0x21   : > { %v533_v29 = vsel %vm301_vm2, %v532_v14, %v531_v24  ;;  %v543_v30 = vsel %vm313_vm5, %v542_v20, %v541_v25  ;;  %v633_v31 = vld [vmem:[%s1095_s28 + $0x2b] sm:$0x1]  ;;  %v634_v32 = vld [vmem:[%s1095_s28 + $0x3b] sm:$0x1]  ;;  %v651_v33 = vrot.slane %v628_v22, 7  ;;  %v653_v34 = vrot.slane %v629_v23, 6 }
  0x22   : > { %v545_v35 = vsel %vm316_vm6, %v544_v21, %v543_v30  ;;  %v655_v36 = vrot.slane %v630_v26, 5  ;;  %v662_v37 = vrot.slane %v631_v27, 4  ;;  %v663_v38 = vrot.slane %v632_v28, 3  ;;  %v286_v40 = vld [vmem:[%s1095_s28 + $0x2] sm:$0x1] }
  0x23   : > { %v580_v41 = vsel %vm329_vm3, %v533_v29, %v545_v35  ;;  %v652_v42 = vsel %vm295_vm0, %v651_v33, %v627_v17  ;;  %v665_v43 = vrot.slane %v633_v31, 2  ;;  %v667_v44 = vrot.slane %v634_v32, 1  ;;  %v287_v45 = vld [vmem:[%s1095_s28 + $0x12] sm:$0x1]  ;;  %v288_v46 = vld [vmem:[%s1095_s28 + $0x22] sm:$0x1] }
  0x24   : > { %599 = vmatpush.msra.mxu2 %v580_v41  ;;  %v654_v47 = vsel %vm298_vm1, %v653_v34, %v652_v42  ;;  %v664_v48 = vsel %vm310_vm4, %v663_v38, %v662_v37  ;;  %v289_v49 = vld [vmem:[%s1095_s28 + $0x32] sm:$0x1]  ;;  %v323_v50 = vrot.slane %v287_v45, 7  ;;  %v325_v51 = vrot.slane %v288_v46, 6  ;;  %v397_v52 = vld [vmem:[%s1095_s28 + $0x6] sm:$0x1] }
  0x25   : > { %v656_v53 = vsel %vm301_vm2, %v655_v36, %v654_v47  ;;  %v666_v54 = vsel %vm313_vm5, %v665_v43, %v664_v48  ;;  %956 = vmatmul.msk.f32.vlgmr.msra.gmra.mxu2 %vm331_vm7, %v1171_v39  ;;  %v327_v55 = vrot.slane %v289_v49, 5  ;;  %v398_v56 = vld [vmem:[%s1095_s28 + $0x16] sm:$0x1]  ;;  %v399_v57 = vld [vmem:[%s1095_s28 + $0x26] sm:$0x1]  ;;  %vm268_vm8 = vcmask 519168  }
  0x26   : > { %v668_v58 = vsel %vm316_vm6, %v667_v44, %v666_v54  ;;  %v324_v59 = vsel %vm295_vm0, %v323_v50, %v286_v40  ;;  %v400_v60 = vld [vmem:[%s1095_s28 + $0x36] sm:$0x1]  ;;  %v451_v61 = vrot.slane %v398_v56, 7  ;;  %v453_v62 = vrot.slane %v399_v57, 6  ;;  %v278_v63 = vld [vmem:[%s1095_s28] sm:$0x1] }
  0x27   : > { %v703_v0 = vsel %vm329_vm3, %v656_v53, %v668_v58  ;;  %v326_v1 = vsel %vm298_vm1, %v325_v51, %v324_v59  ;;  %v455_v2 = vrot.slane %v400_v60, 5  ;;  %v279_v3 = vld [vmem:[%s1095_s28 + $0x10] sm:$0x1]  ;;  %v280_v4 = vld [vmem:[%s1095_s28 + $0x20] sm:$0x1]  ;;  %v1034_v60 = vmov 0.0  }
  0x28   : > { %722 = vmatpush.msra.mxu3 %v703_v0  ;;  %v328_v5 = vsel %vm301_vm2, %v327_v55, %v326_v1  ;;  %v452_v6 = vsel %vm295_vm0, %v451_v61, %v397_v52  ;;  %v281_v7 = vld [vmem:[%s1095_s28 + $0x30] sm:$0x1]  ;;  %v282_v8 = vld [vmem:[%s1095_s28 + $0x1] sm:$0x1]  ;;  %v283_v9 = vld [vmem:[%s1095_s28 + $0x11] sm:$0x1] }
  0x29   : > { %958 = vmatmul.msk.f32.vlgmr.msra.gmra.mxu3 %vm331_vm7, %v1171_v39  ;;  %951 = vmatpush.msk.msra.mxu0 %vm329_vm3, %v328_v5  ;;  %v454_v10 = vsel %vm298_vm1, %v453_v62, %v452_v6  ;;  %v284_v11 = vld [vmem:[%s1095_s28 + $0x21] sm:$0x1]  ;;  %v285_v12 = vld [vmem:[%s1095_s28 + $0x31] sm:$0x1]  ;;  %v294_v13 = vrot.slane %v279_v3, 7  ;;  %v297_v14 = vrot.slane %v280_v4, 6 }
  0x2a   : > { %v456_v15 = vsel %vm301_vm2, %v455_v2, %v454_v10  ;;  %v300_v16 = vrot.slane %v281_v7, 5  ;;  %v308_v17 = vrot.slane %v282_v8, 4  ;;  %v309_v18 = vrot.slane %v283_v9, 3  ;;  %v389_v19 = vld [vmem:[%s1095_s28 + $0x4] sm:$0x1] }
  0x2b   : > { %953 = vmatpush.msk.msra.mxu1 %vm329_vm3, %v456_v15  ;;  %v296_v20 = vsel %vm295_vm0, %v294_v13, %v278_v63  ;;  %v312_v21 = vrot.slane %v284_v11, 2  ;;  %v315_v22 = vrot.slane %v285_v12, 1  ;;  %v390_v23 = vld [vmem:[%s1095_s28 + $0x14] sm:$0x1]  ;;  %v391_v24 = vld [vmem:[%s1095_s28 + $0x24] sm:$0x1] }
  0x2c   : > { %v299_v25 = vsel %vm298_vm1, %v297_v14, %v296_v20  ;;  %v311_v26 = vsel %vm310_vm4, %v309_v18, %v308_v17  ;;  %v392_v27 = vld [vmem:[%s1095_s28 + $0x34] sm:$0x1]  ;;  %v393_v28 = vld [vmem:[%s1095_s28 + $0x5] sm:$0x1]  ;;  %v394_v29 = vld [vmem:[%s1095_s28 + $0x15] sm:$0x1] }
  0x2d   : > { %v302_v30 = vsel %vm301_vm2, %v300_v16, %v299_v25  ;;  %v314_v31 = vsel %vm313_vm5, %v312_v21, %v311_v26  ;;  %v395_v32 = vld [vmem:[%s1095_s28 + $0x25] sm:$0x1]  ;;  %v396_v33 = vld [vmem:[%s1095_s28 + $0x35] sm:$0x1]  ;;  %v428_v34 = vrot.slane %v390_v23, 7  ;;  %v430_v35 = vrot.slane %v391_v24, 6 }
  0x2e   : > { %v317_v36 = vsel %vm316_vm6, %v315_v22, %v314_v31  ;;  %v432_v37 = vrot.slane %v392_v27, 5  ;;  %v439_v38 = vrot.slane %v393_v28, 4  ;;  %v440_v40 = vrot.slane %v394_v29, 3  ;;  %v381_v41 = vld [vmem:[%s1095_s28 + $0x2] sm:$0x1] }
  0x2f   : > { %v330_v42 = vsel %vm329_vm3, %v302_v30, %v317_v36  ;;  %v429_v43 = vsel %vm295_vm0, %v428_v34, %v389_v19  ;;  %v442_v44 = vrot.slane %v395_v32, 2  ;;  %v444_v45 = vrot.slane %v396_v33, 1  ;;  %v382_v46 = vld [vmem:[%s1095_s28 + $0x12] sm:$0x1]  ;;  %v383_v47 = vld [vmem:[%s1095_s28 + $0x22] sm:$0x1] }
  0x30   : > { %351 = vmatpush.msra.mxu0 %v330_v42  ;;  %v431_v48 = vsel %vm298_vm1, %v430_v35, %v429_v43  ;;  %v441_v49 = vsel %vm310_vm4, %v440_v40, %v439_v38  ;;  %v384_v50 = vld [vmem:[%s1095_s28 + $0x32] sm:$0x1]  ;;  %v385_v51 = vld [vmem:[%s1095_s28 + $0x3] sm:$0x1]  ;;  %v386_v52 = vld [vmem:[%s1095_s28 + $0x13] sm:$0x1] }
  0x31   : > { %v433_v53 = vsel %vm301_vm2, %v432_v37, %v431_v48  ;;  %v443_v54 = vsel %vm313_vm5, %v442_v44, %v441_v49  ;;  %v387_v55 = vld [vmem:[%s1095_s28 + $0x23] sm:$0x1]  ;;  %v388_v56 = vld [vmem:[%s1095_s28 + $0x33] sm:$0x1]  ;;  %v405_v57 = vrot.slane %v382_v46, 7  ;;  %v407_v58 = vrot.slane %v383_v47, 6 }
  0x32   : > { %v445_v59 = vsel %vm316_vm6, %v444_v45, %v443_v54  ;;  %352 = vmatpush.msra.mxu0 %v1034_v60  ;;  %v409_v61 = vrot.slane %v384_v50, 5  ;;  %v416_v62 = vrot.slane %v385_v51, 4  ;;  %v417_v63 = vrot.slane %v386_v52, 3  ;;  %v1005_v0 = vld [vmem:[%s1359_s3 + $0x7] ss:$0 sm:$0xff] }
  0x33   : > { %v458_v1 = vsel %vm329_vm3, %v433_v53, %v445_v59  ;;  %v406_v2 = vsel %vm295_vm0, %v405_v57, %v381_v41  ;;  %v419_v3 = vrot.slane %v387_v55, 2  ;;  %v421_v4 = vrot.slane %v388_v56, 1  ;;  %952 = vmatmul.msk.f32.vlgmr.msra.gmra.mxu0 %vm331_vm7, %v1171_v39  ;;  %v1006_v5 = vld [vmem:[%s1359_s3 + $0x6] ss:$0 sm:$0xff]  ;;  %v1007_v6 = vld [vmem:[%s1359_s3 + $0x4] ss:$0 sm:$0xff]  ;;  %811 = vperm.xlu1 %999, %v1005_v0  }
  0x34   : > { %475 = vmatpush.msra.mxu1 %v458_v1  ;;  %v408_v7 = vsel %vm298_vm1, %v407_v58, %v406_v2  ;;  %v418_v8 = vsel %vm310_vm4, %v417_v63, %v416_v62  ;;  %807 = vperm.xlu0 %998, %v1006_v5   ;;  %v1008_v13 = vld [vmem:[%s1359_s3 + $0x5] ss:$0 sm:$0xff]  ;;  %v260_v14 = vld [vmem:[%s1266_s22] sm:$0xf]  ;;  %v263_v16 = vld [vmem:[%s1266_s22 + $0xc] sm:$0xf] }
  0x35   : > { %v410_v9 = vsel %vm301_vm2, %v409_v61, %v408_v7  ;;  %v420_v10 = vsel %vm313_vm5, %v419_v3, %v418_v8  ;;  %799 = vperm.xlu2 %1000, %v1007_v6   ;;  %v261_v15 = vld [vmem:[%s1266_s22 + $0x4] sm:$0xf]  ;;  %269 = vst.msk [vmem:[%s1275_s26] sm:$0xf] %vm268_vm8, %v260_v14  ;;  %v264_v17 = vld [vmem:[%s1266_s22 + $0x10] sm:$0xf] }
  0x36   : > { %v422_v11 = vsel %vm316_vm6, %v421_v4, %v420_v10  ;;  %270 = vst.msk [vmem:[%s1275_s26 + $0x4] sm:$0xf] %vm268_vm8, %v261_v15  ;;  %vm372_vm9 = vcmask 516096   ;;  %v265_v18 = vld [vmem:[%s1266_s22 + $0x14] sm:$0xf] }
  0x37   : > { %v457_v12 = vsel %vm329_vm3, %v410_v9, %v422_v11  ;;  %272 = vst.msk [vmem:[%s1275_s26 + $0xc] sm:$0xf] %vm268_vm8, %v263_v16  ;;  %v266_v47 = vld [vmem:[%s1266_s22 + $0x18] sm:$0xf]  ;;  %v267_v48 = vld [vmem:[%s1266_s22 + $0x1c] sm:$0xf] }
  0x38   : > { %476 = vmatpush.msra.mxu1 %v457_v12  ;;  %273 = vst.msk [vmem:[%s1275_s26 + $0x10] sm:$0xf] %vm268_vm8, %v264_v17 }
  0x39   : > { %954 = vmatmul.msk.f32.vlgmr.msra.gmra.mxu1 %vm331_vm7, %v1171_v39  ;;  %v262_v39 = vld [vmem:[%s1266_s22 + $0x8] sm:$0xf]  ;;  %274 = vst.msk [vmem:[%s1275_s26 + $0x14] sm:$0xf] %vm268_vm8, %v265_v18 }
  0x3a   : > { %271 = vst.msk [vmem:[%s1275_s26 + $0x8] sm:$0xf] %vm268_vm8, %v262_v39 }
  0x3b   : > { %275 = vst.msk [vmem:[%s1275_s26 + $0x18] sm:$0xf] %vm268_vm8, %v266_v47 }
  0x3c   : > { %276 = vst.msk [vmem:[%s1275_s26 + $0x1c] sm:$0xf] %vm268_vm8, %v267_v48 }
  0x3d   : > { %803 = vperm.xlu2 %1000, %v1008_v13  }
  0x80   : > { %v792_v45 = vpop.permute.xlu1 %791 }
  0x81   : > { %v784_v43 = vpop.permute.xlu0 %783 }
  0x88   : > { %v796_v58 = vpop.permute.xlu1 %795 }
  0x89   : > { %v788_v56 = vpop.permute.xlu0 %787 }
  0x8f   : > { %v800_v54 = vpop.permute.xlu2 %799 }
  0x97   : > { %v804_v8 = vpop.permute.xlu2 %803 }
  0xa5   : > { %v812_v14 = vpop.permute.xlu1 %811 }
  0xa6   : > { %v808_v10 = vpop.permute.xlu0 %807 }
  0xa8   : > { %v601_v19 = vpop.f32.mrf.mxu2 }
  0xa9   : > { %v605_v20 = vrot.slane %v601_v19, 1  ;;  %v606_v21 = vrot.slane %v601_v19, 2  ;;  %v607_v22 = vrot.slane %v601_v19, 3  ;;  %619 = vst.msk [vmem:[#allocation2 + $0x2] sm:$0x1] %vm372_vm9, %v601_v19  ;;  %v608_v23 = vrot.slane %v601_v19, 4 }
  0xaa   : > { %v609_v24 = vrot.slane %v601_v19, 5  ;;  %v610_v25 = vrot.slane %v601_v19, 6  ;;  %v611_v26 = vrot.slane %v601_v19, 7 }
  0xab   : > { %620 = vst.msk [vmem:[#allocation2 + $0x6] sm:$0x1] %vm372_vm9, %v605_v20 }
  0xac   : > { %621 = vst.msk [vmem:[#allocation2 + $0xa] sm:$0x1] %vm372_vm9, %v606_v21  ;;  %v724_v46 = vpop.f32.mrf.mxu3 }
  0xad   : > { %622 = vst.msk [vmem:[#allocation2 + $0xe] sm:$0x1] %vm372_vm9, %v607_v22  ;;  %v728_v49 = vrot.slane %v724_v46, 1  ;;  %v729_v50 = vrot.slane %v724_v46, 2  ;;  %v730_v51 = vrot.slane %v724_v46, 3  ;;  %v731_v52 = vrot.slane %v724_v46, 4 }
  0xae   : > { %623 = vst.msk [vmem:[#allocation2 + $0x12] sm:$0x1] %vm372_vm9, %v608_v23  ;;  %v732_v53 = vrot.slane %v724_v46, 5  ;;  %v733_v55 = vrot.slane %v724_v46, 6  ;;  %v734_v57 = vrot.slane %v724_v46, 7 }
  0xaf   : > { %624 = vst.msk [vmem:[#allocation2 + $0x16] sm:$0x1] %vm372_vm9, %v609_v24 }
  0xb0   : > { %v354_v27 = vpop.f32.mrf.mxu0  ;;  %625 = vst.msk [vmem:[#allocation2 + $0x1a] sm:$0x1] %vm372_vm9, %v610_v25 }
  0xb1   : > { %v358_v28 = vrot.slane %v354_v27, 1  ;;  %v359_v29 = vrot.slane %v354_v27, 2  ;;  %v360_v30 = vrot.slane %v354_v27, 3  ;;  %373 = vst.msk [vmem:[#allocation2] sm:$0x1] %vm372_vm9, %v354_v27  ;;  %v361_v31 = vrot.slane %v354_v27, 4 }
  0xb2   : > { %626 = vst.msk [vmem:[#allocation2 + $0x1e] sm:$0x1] %vm372_vm9, %v611_v26  ;;  %v362_v32 = vrot.slane %v354_v27, 5  ;;  %v363_v33 = vrot.slane %v354_v27, 6  ;;  %v364_v34 = vrot.slane %v354_v27, 7 }
  0xb3   : > { %374 = vst.msk [vmem:[#allocation2 + $0x4] sm:$0x1] %vm372_vm9, %v358_v28 }
  0xb4   : > { %375 = vst.msk [vmem:[#allocation2 + $0x8] sm:$0x1] %vm372_vm9, %v359_v29 }
  0xb5   : > { %376 = vst.msk [vmem:[#allocation2 + $0xc] sm:$0x1] %vm372_vm9, %v360_v30 }
  0xb6   : > { %377 = vst.msk [vmem:[#allocation2 + $0x10] sm:$0x1] %vm372_vm9, %v361_v31  ;;  %v478_v35 = vpop.f32.mrf.mxu1 }
  0xb7   : > { %378 = vst.msk [vmem:[#allocation2 + $0x14] sm:$0x1] %vm372_vm9, %v362_v32  ;;  %v482_v36 = vrot.slane %v478_v35, 1  ;;  %v483_v37 = vrot.slane %v478_v35, 2  ;;  %v484_v38 = vrot.slane %v478_v35, 3  ;;  %v485_v40 = vrot.slane %v478_v35, 4 }
  0xb8   : > { %379 = vst.msk [vmem:[#allocation2 + $0x18] sm:$0x1] %vm372_vm9, %v363_v33  ;;  %v486_v41 = vrot.slane %v478_v35, 5  ;;  %v487_v42 = vrot.slane %v478_v35, 6  ;;  %v488_v44 = vrot.slane %v478_v35, 7 }
  0xb9   : > { %380 = vst.msk [vmem:[#allocation2 + $0x1c] sm:$0x1] %vm372_vm9, %v364_v34 }
  0xba   : > { %496 = vst.msk [vmem:[#allocation2 + $0x1] sm:$0x1] %vm372_vm9, %v478_v35 }
  0xbb   : > { %497 = vst.msk [vmem:[#allocation2 + $0x5] sm:$0x1] %vm372_vm9, %v482_v36 }
  0xbc   : > { %498 = vst.msk [vmem:[#allocation2 + $0x9] sm:$0x1] %vm372_vm9, %v483_v37 }
  0xbd   : > { %499 = vst.msk [vmem:[#allocation2 + $0xd] sm:$0x1] %vm372_vm9, %v484_v38 }
  0xbe   : > { %500 = vst.msk [vmem:[#allocation2 + $0x11] sm:$0x1] %vm372_vm9, %v485_v40 }
  0xbf   : > { %501 = vst.msk [vmem:[#allocation2 + $0x15] sm:$0x1] %vm372_vm9, %v486_v41 }
  0xc0   : > { %502 = vst.msk [vmem:[#allocation2 + $0x19] sm:$0x1] %vm372_vm9, %v487_v42 }
  0xc1   : > { %503 = vst.msk [vmem:[#allocation2 + $0x1d] sm:$0x1] %vm372_vm9, %v488_v44 }
  0xc2   : > { %742 = vst.msk [vmem:[#allocation2 + $0x3] sm:$0x1] %vm372_vm9, %v724_v46 }
  0xc3   : > { %743 = vst.msk [vmem:[#allocation2 + $0x7] sm:$0x1] %vm372_vm9, %v728_v49 }
  0xc4   : > { %744 = vst.msk [vmem:[#allocation2 + $0xb] sm:$0x1] %vm372_vm9, %v729_v50 }
  0xc5   : > { %745 = vst.msk [vmem:[#allocation2 + $0xf] sm:$0x1] %vm372_vm9, %v730_v51 }
  0xc6   : > { %746 = vst.msk [vmem:[#allocation2 + $0x13] sm:$0x1] %vm372_vm9, %v731_v52 }
  0xc7   : > { %747 = vst.msk [vmem:[#allocation2 + $0x17] sm:$0x1] %vm372_vm9, %v732_v53 }
  0xc8   : > { %748 = vst.msk [vmem:[#allocation2 + $0x1b] sm:$0x1] %vm372_vm9, %v733_v55 }
  0xc9   : > { %749 = vst.msk [vmem:[#allocation2 + $0x1f] sm:$0x1] %vm372_vm9, %v734_v57  ;;  %v750_v59 = vld [vmem:[#allocation2] sm:$0xf] }
  0xca   : > { %v751_v60 = vld [vmem:[#allocation2 + $0x4] sm:$0xf]  ;;  %v814_v61 = vadd.f32 %v784_v43, %v750_v59 }
  0xcb   : > { %v752_v62 = vld [vmem:[#allocation2 + $0x8] sm:$0xf]  ;;  %v815_v63 = vadd.f32 %v788_v56, %v751_v60 }
  0xcc   : > { %v753_v0 = vld [vmem:[#allocation2 + $0xc] sm:$0xf]  ;;  %v816_v1 = vadd.f32 %v792_v45, %v752_v62  ;;  %v822_v2 = vmax.f32 %v814_v61, 0.0 }
  0xcd   : > { %v754_v3 = vld [vmem:[#allocation2 + $0x10] sm:$0xf]  ;;  %v817_v4 = vadd.f32 %v796_v58, %v753_v0  ;;  %v823_v5 = vmax.f32 %v815_v63, 0.0 }
  0xce   : > { %v818_v6 = vadd.f32 %v800_v54, %v754_v3  ;;  %v824_v7 = vmax.f32 %v816_v1, 0.0  ;;  %959 = vst.msk [vmem:[%s1275_s26 + $0x20] sm:$0xf] %vm268_vm8, %v822_v2  ;;  %v755_v9 = vld [vmem:[#allocation2 + $0x14] sm:$0xf] }
  0xcf   : > { %v756_v11 = vld [vmem:[#allocation2 + $0x18] sm:$0xf]  ;;  %v825_v12 = vmax.f32 %v817_v4, 0.0  ;;  %960 = vst.msk [vmem:[%s1275_s26 + $0x24] sm:$0xf] %vm268_vm8, %v823_v5  ;;  %v819_v13 = vadd.f32 %v804_v8, %v755_v9 }
  0xd0   : > { %v757_v15 = vld [vmem:[#allocation2 + $0x1c] sm:$0xf]  ;;  %v820_v39 = vadd.f32 %v808_v10, %v756_v11  ;;  %v826_v16 = vmax.f32 %v818_v6, 0.0  ;;  %961 = vst.msk [vmem:[%s1275_s26 + $0x28] sm:$0xf] %vm268_vm8, %v824_v7 }
  0xd1   : > { %v821_v17 = vadd.f32 %v812_v14, %v757_v15  ;;  %962 = vst.msk [vmem:[%s1275_s26 + $0x2c] sm:$0xf] %vm268_vm8, %v825_v12  ;;  %v827_v18 = vmax.f32 %v819_v13, 0.0 }
  0xd2   : > { %v828_v19 = vmax.f32 %v820_v39, 0.0  ;;  %963 = vst.msk [vmem:[%s1275_s26 + $0x30] sm:$0xf] %vm268_vm8, %v826_v16 }
  0xd3   : > { %v829_v20 = vmax.f32 %v821_v17, 0.0  ;;  %964 = vst.msk [vmem:[%s1275_s26 + $0x34] sm:$0xf] %vm268_vm8, %v827_v18 }
  0xd4   : > { %965 = vst.msk [vmem:[%s1275_s26 + $0x38] sm:$0xf] %vm268_vm8, %v828_v19 }
  0xd5   : > { %966 = vst.msk [vmem:[%s1275_s26 + $0x3c] sm:$0xf] %vm268_vm8, %v829_v20 }
  0xd6 PF: > { %s14_s17 = sadd.s32 1, %s1031_s17   ;;  %s1361_s15 = smov %s1027_s16 }
  0xd7   : > { %p11_p5 = scmp.ge.s32.totalorder %s14_s17, 4   ;;  %s1362_s16 = smov %s1364_s18 }
  0xd9   :  { %13 = sbr.rel (!%p11_p5) target bundleno = 2 (0x2), region = 70 }

</bundles_post_ra>
